<compile_context>
chip_gen: v5e
topology: v5e:2x2
jax: 0.10.0
libtpu: 0.0.40
codegen_flags: <defaults>
</compile_context>

<pallas_src>
import functools

import jax
import jax.numpy as jnp
from jax.experimental import pallas as pl
from jax.experimental.pallas import tpu as pltpu


# --------------------------------------------------------------------------
# kernels
# --------------------------------------------------------------------------
def _droppath_kernel(keep_ref, x_ref, o_ref, *, inv_keep_prob):
    # keep_ref: (B,) int32 in SMEM (scalar prefetch); 1 = keep sample, 0 = drop.
    b = pl.program_id(0)
    scale = jnp.where(keep_ref[b] > 0, inv_keep_prob, 0.0).astype(jnp.float32)
    o_ref[...] = (x_ref[...].astype(jnp.float32) * scale).astype(o_ref.dtype)


def _droppath_residual_kernel(keep_ref, x_ref, res_ref, o_ref, *, inv_keep_prob):
    b = pl.program_id(0)
    scale = jnp.where(keep_ref[b] > 0, inv_keep_prob, 0.0).astype(jnp.float32)
    o_ref[...] = (res_ref[...].astype(jnp.float32)
                  + x_ref[...].astype(jnp.float32) * scale).astype(o_ref.dtype)


# --------------------------------------------------------------------------
# tiling helper: dense (rows, 128) tiles, ~8 MiB blocks, v7x-safe VMEM budget
# --------------------------------------------------------------------------
def _pick_tile_rows(rows, itemsize, n_streams):
    # Keep 2 * n_streams double-buffered blocks comfortably under v7x's
    # 64 MiB physical VMEM while using big (~8 MiB) blocks to amortize the
    # ~0.35 us per-grid-step overhead on fast-HBM chips.
    max_block_bytes = min(8 << 20, (44 << 20) // (2 * n_streams))
    max_rows = max(8, (max_block_bytes // (128 * itemsize)) // 8 * 8)
    return rows if rows <= max_rows else max_rows


# --------------------------------------------------------------------------
# public wrapper (PyTorch-equivalent forward)
# --------------------------------------------------------------------------
def drop_path(x, drop_prob, key, training=True, residual=None):
    """Stochastic depth. If `residual` is given, returns residual + drop_path(x)
    fused in the same kernel (one fewer HBM read+write pass)."""
    if (not training) or drop_prob is None or drop_prob == 0.0:
        return x if residual is None else residual + x

    keep_prob = 1.0 - float(drop_prob)
    B = x.shape[0]
    N = 1
    for d in x.shape[1:]:
        N *= d

    # Per-sample keep mask (B values) drawn outside the kernel from a traced key.
    keep = jax.random.bernoulli(key, p=keep_prob, shape=(B,)).astype(jnp.int32)

    # Lay each sample's features out as dense (rows, 128) lane tiles.
    n_pad = (-N) % 128
    xf = x.reshape(B, N)
    rf = residual.reshape(B, N) if residual is not None else None
    if n_pad:
        xf = jnp.pad(xf, ((0, 0), (0, n_pad)))
        if rf is not None:
            rf = jnp.pad(rf, ((0, 0), (0, n_pad)))
    Np = N + n_pad
    R = Np // 128
    xf = xf.reshape(B, R, 128)
    if rf is not None:
        rf = rf.reshape(B, R, 128)

    n_streams = 2 if residual is None else 3
    itemsize = jnp.dtype(x.dtype).itemsize
    tile_r = _pick_tile_rows(R, itemsize, n_streams)
    grid = (B, pl.cdiv(R, tile_r))

    spec = pl.BlockSpec((None, tile_r, 128), lambda b, r, keep_ref: (b, r, 0))
    in_specs = [spec] if residual is None else [spec, spec]
    kern = _droppath_kernel if residual is None else _droppath_residual_kernel
    kernel = functools.partial(kern, inv_keep_prob=1.0 / keep_prob)

    block_bytes = tile_r * 128 * itemsize
    vmem_limit = min(48 << 20, max(32 << 20, 2 * n_streams * block_bytes + (2 << 20)))

    out = pl.pallas_call(
        kernel,
        out_shape=jax.ShapeDtypeStruct((B, R, 128), x.dtype),
        grid_spec=pltpu.PrefetchScalarGridSpec(
            num_scalar_prefetch=1,          # keep mask -> SMEM
            grid=grid,
            in_specs=in_specs,
            out_specs=spec,
        ),
        compiler_params=pltpu.CompilerParams(
            dimension_semantics=("parallel", "parallel"),
            vmem_limit_bytes=vmem_limit,
        ),
    )(keep, xf, *(() if rf is None else (rf,)))

    out = out.reshape(B, Np)
    if n_pad:
        out = out[:, :N]
    return out.reshape(x.shape)


# --------------------------------------------------------------------------
if __name__ == "__main__":
    key = jax.random.PRNGKey(0)
    B, C, H, W = 2, 4, 16, 16
    xkey, mkey, rkey, m2key = jax.random.split(key, 4)
    x = jax.random.normal(xkey, (B, C, H, W), jnp.float32)   # NCHW, like PyTorch
    drop_prob = 0.25
    keep_prob = 1.0 - drop_prob

    # ---- training-mode stochastic depth (Pallas kernel path) ----
    fwd = jax.jit(lambda a, k: drop_path(a, drop_prob, k, training=True))
    y = fwd(x, mkey)
    jax.block_until_ready(y)
    assert y.shape == x.shape and y.dtype == x.dtype
    assert bool(jnp.all(jnp.isfinite(y)))

    # exact reference: same Bernoulli draw applied per sample
    keep_ref = jax.random.bernoulli(mkey, p=keep_prob, shape=(B,))
    scale_ref = jnp.where(keep_ref, 1.0 / keep_prob, 0.0)[:, None, None, None]
    assert bool(jnp.allclose(y, x * scale_ref, rtol=1e-6, atol=1e-6))

    # structural check: each sample is either fully dropped or exactly x/keep_prob
    xr, yr = x.reshape(B, -1), y.reshape(B, -1)
    for b in range(B):
        kept = bool(jnp.allclose(yr[b], xr[b] / keep_prob, rtol=1e-6, atol=1e-6))
        dropped = bool(jnp.all(yr[b] == 0.0))
        assert kept or dropped

    # ---- fused residual add: out = residual + drop_path(branch) ----
    res = jax.random.normal(rkey, (B, C, H, W), jnp.float32)
    y_fused = jax.jit(
        lambda a, r, k: drop_path(a, drop_prob, k, training=True, residual=r)
    )(x, res, m2key)
    jax.block_until_ready(y_fused)
    keep2 = jax.random.bernoulli(m2key, p=keep_prob, shape=(B,))
    scale2 = jnp.where(keep2, 1.0 / keep_prob, 0.0)[:, None, None, None]
    assert bool(jnp.allclose(y_fused, res + x * scale2, rtol=1e-6, atol=1e-6))

    # ---- bf16 activation stream also supported ----
    y_bf16 = drop_path(x.astype(jnp.bfloat16), drop_prob, mkey, training=True)
    jax.block_until_ready(y_bf16)
    assert y_bf16.dtype == jnp.bfloat16 and y_bf16.shape == x.shape

    # ---- eval mode / drop_prob == 0 are exact identity (as in PyTorch) ----
    assert bool(jnp.all(drop_path(x, drop_prob, mkey, training=False) == x))
    assert bool(jnp.all(drop_path(x, 0.0, mkey, training=True) == x))

    print("KERNEL_OK")
</pallas_src>

<mosaic_0001>
module attributes {stable_mosaic.version = 11 : i64} {
  func.func @_droppath_kernel(%arg0: i32, %arg1: i32, %arg2: memref<2xi32, #tpu.memory_space<smem>>, %arg3: memref<1x8x128xf32, #tpu.memory_space<vmem>>, %arg4: memref<1x8x128xf32, #tpu.memory_space<vmem>>) attributes {dimension_semantics = [#tpu.dimension_semantics<parallel>, #tpu.dimension_semantics<parallel>], iteration_bounds = array<i64: 2, 1>, scalar_prefetch = 1 : i64, scratch_operands = 0 : i64, tpu.core_type = #tpu.core_type<tc>, window_params = [{transform_indices = @transform_0, window_bounds = array<i64: 1, 8, 128>}, {transform_indices = @transform_1, window_bounds = array<i64: 1, 8, 128>}]} {
    %0 = arith.index_cast %arg0 : i32 to index
    %1 = memref.load %arg2[%0] : memref<2xi32, #tpu.memory_space<smem>>
    %c0_i32 = arith.constant 0 : i32
    %2 = arith.cmpi sgt, %1, %c0_i32 : i32
    %cst = arith.constant 1.33333337 : f32
    %cst_0 = arith.constant 0.000000e+00 : f32
    %3 = arith.select %2, %cst, %cst_0 : f32
    %c0 = arith.constant 0 : index
    %c0_1 = arith.constant 0 : index
    %c0_2 = arith.constant 0 : index
    %4 = vector.load %arg3[%c0, %c0_1, %c0_2] : memref<1x8x128xf32, #tpu.memory_space<vmem>>, vector<1x8x128xf32>
    %5 = vector.shape_cast %4 : vector<1x8x128xf32> to vector<8x128xf32>
    %6 = vector.broadcast %3 : f32 to vector<8x128xf32>
    %7 = arith.mulf %5, %6 : vector<8x128xf32>
    %c0_3 = arith.constant 0 : index
    %c0_4 = arith.constant 0 : index
    %c0_5 = arith.constant 0 : index
    %8 = vector.load %arg4[%c0_3, %c0_4, %c0_5] : memref<1x8x128xf32, #tpu.memory_space<vmem>>, vector<1x8x128xf32>
    %9 = vector.shape_cast %8 : vector<1x8x128xf32> to vector<8x128xf32>
    %10 = vector.shape_cast %7 : vector<8x128xf32> to vector<1x8x128xf32>
    tpu.vector_store %arg4[%c0_3, %c0_4, %c0_5], %10 {strides = array<i32>} : memref<1x8x128xf32, #tpu.memory_space<vmem>>, vector<1x8x128xf32>,
    return
  }
  func.func @transform_0(%arg0: i32, %arg1: i32, %arg2: memref<2xi32, #tpu.memory_space<smem>>) -> (i32, i32, i32) {
    %c0_i32 = arith.constant 0 : i32
    %c0_i32_0 = arith.constant 0 : i32
    return %arg0, %arg1, %c0_i32 : i32, i32, i32
  }
  func.func @transform_1(%arg0: i32, %arg1: i32, %arg2: memref<2xi32, #tpu.memory_space<smem>>) -> (i32, i32, i32) {
    %c0_i32 = arith.constant 0 : i32
    %c0_i32_0 = arith.constant 0 : i32
    return %arg0, %arg1, %c0_i32 : i32, i32, i32
  }
}

</mosaic_0001>

<bundles_post_ra>
// kernel: _lambda_.1
= control target key start
LH: loop header
LB: loop body
LE: loop exit
PB: predicated region body
PF: predicated region fallthrough
CT: control target
= control target key end

     0   :  { %s305_s12 = smov [#allocation3]   ;;  %s345_s0 = inlined_call_operand.vmem [shape: s32[2], index: 0, kind: input, shape index: {}]   ;;  %s346_s1 = inlined_call_operand.vmem [shape: f32[2,8,128], index: 1, kind: input, shape index: {}]   ;;  %s347_s2 = inlined_call_operand.vmem [shape: f32[2,8,128], index: 2, kind: output, shape index: {}]  }
   0x1   :  { %s8_s11 = sshll.u32 %s345_s0, 4  ;;  %s9_s11 = int_to_ptr.vmem [resolvable:$true] %s8_s11 }
   0x2   :  { %11 = dma.vmem_to_smem %s9_s11, 16, %s305_s12, [#allocation2] }
   0x3   :  { %291 = dma.done.wait [#allocation2], 16 }
   0x4   :  { %292 = vsyncadd [#allocation2], 4294967280 }
   0x5   :  { %14 = sfence }
   0x6   :  { %s324_s13 = smov 0   ;;  %s326_s14 = smov 0  }
   0x7   :  { %s328_s15 = smov 0  }
   0x8 LB: > { %s32_s0 = sadd.s32 1, %s299_s14  ;;  %p237_p0 = scmp.ge.s32.totalorder %s303_s15, 1  ;;  %s303_s15 = sphi %s328_s15, %s20_s15   ;;  %s299_s14 = sphi %s326_s14, %s349_s14   ;;  %s295_s13 = sphi %s324_s13, %s348_s13  }
   0x9   : > { %p34_p1 = scmp.ge.s32.totalorder %s32_s0, 2  ;;  %p114_p2 = scmp.lt.s32.totalorder %s303_s15, 3 }
   0xb   : > { %s351_s0 = smov (%p34_p1, %s32_s0), 0  ;;  %p115_p3 = pnand %p237_p0, %p114_p2 }
   0xc   : > { %p138_p4 = scmp.lt.s32.totalorder (!%p115_p3), %s295_s13, 1  ;;  %s152_s16 = sld [smem:[#allocation3 + %s295_s13]] (!%p115_p3) }
   0xd   : > { %118 = sbr.rel (%p115_p3) target bundleno = 27 (0x1b), region = 24 }
  0x12   : > { %s353_s13 = smov (!%p138_p4, %s295_s13), 1  ;;  %p153_p5 = scmp.gt.s32.totalorder %s152_s16, 0 }
  0x13   : > { %s238_s17 = sshll.u32 %s353_s13, 3 }
  0x14   : > { %s144_s20 = scalar_lea.vmem %s346_s1, %s238_s17  ;;  %s151_s24 = scalar_lea.vmem %s347_s2, %s238_s17 }
  0x15   : > { %s154_s21 = scalar_select %p153_p5, 1.3333334, 0.0  ;;  %v155_v0 = vld [vmem:[%s144_s20] sm:$0xff] }
  0x17   : > { %v156_v1 = vstv %s154_s21 }
  0x18   : > { %v157_v2 = vmul.f32 %v156_v1, %v155_v0 }
  0x1a   : > { %158 = vst [vmem:[%s151_s24] sm:$0xff] %v157_v2 }
  0x1b PF: > { %s20_s15 = sadd.s32 1, %s303_s15   ;;  %s348_s13 = smov %s299_s14 }
  0x1c   : > { %p17_p6 = scmp.ge.s32.totalorder %s20_s15, 4   ;;  %s349_s14 = smov %s351_s0 }
  0x1e   :  { %19 = sbr.rel (!%p17_p6) target bundleno = 8 (0x8), region = 54 }

</bundles_post_ra>
